<compile_context>
chip_gen: v5e
topology: v5e:2x2
jax: 0.10.0
libtpu: 0.0.40
codegen_flags: <defaults>
</compile_context>

<pallas_src>
import jax
import jax.numpy as jnp
from jax import lax
from jax.experimental import pallas as pl
from jax.experimental.pallas import tpu as pltpu

IN_FEATURES = 28 * 28      # 784
HIDDEN = 200
N_CLASSES = 10
OUT_PAD = 128              # lane-dense padded output width (multiple of 128)
LEAKY_SLOPE = 0.01         # PyTorch LeakyReLU default
LN_EPS = 1e-5              # PyTorch LayerNorm default
MAX_TB = 1024              # max batch-tile rows per grid step (v5e 16 MiB safe)


def _round_up(n, m):
    return ((n + m - 1) // m) * m


def _choose_tb(batch):
    """Batch tile: full-extent for tiny B, otherwise ~ceil(B/2) (8-aligned, so the
    v7x 2-TC grid split gets >= 2 steps), capped at MAX_TB."""
    if batch <= 16:
        return batch                       # single full-extent tile (always legal)
    half = _round_up(-(-batch // 2), 8)    # ceil(B/2) rounded up to sublane (f32: 8)
    return min(MAX_TB, half)


def mlp_kernel(x_ref, w1_ref, b1_ref, w2_ref, b2_ref, o_ref):
    # x_ref:  (TB, 784)  f32   (cast to bf16 in-kernel, hidden under the MXU)
    # w1_ref: (784, 200) bf16      b1_ref: (1, 200) f32
    # w2_ref: (200, 128) bf16 (LayerNorm affine folded in, zero-padded cols)
    # b2_ref: (1, 128)   f32  (beta @ w2 + b2, zero-padded cols)
    # o_ref:  (TB, 128)  bf16 (lane-dense padded logits)

    x = x_ref[...].astype(jnp.bfloat16)

    # Linear 1: bf16 x bf16 -> f32 accumulation on the MXU.
    h = jnp.dot(x, w1_ref[...], preferred_element_type=jnp.float32)
    h = h + b1_ref[...]

    # LeakyReLU (f32 on the VPU).
    h = jnp.where(h > 0, h, LEAKY_SLOPE * h)

    # LayerNorm over last dim (biased variance, eps=1e-5); affine folded into w2/b2.
    mean = jnp.mean(h, axis=-1, keepdims=True)
    centered = h - mean
    var = jnp.mean(centered * centered, axis=-1, keepdims=True)
    h = centered * lax.rsqrt(var + LN_EPS)

    # Linear 2 (with folded gamma/beta), lane-dense 128-wide output tile, bf16 writeback.
    out = jnp.dot(h.astype(jnp.bfloat16), w2_ref[...],
                  preferred_element_type=jnp.float32) + b2_ref[...]
    o_ref[...] = out.astype(o_ref.dtype)


def prepare_params(params):
    """One-time host-side prep: fold LayerNorm affine into Linear2, pad the
    output dim to 128 lanes, cast weights to bf16."""
    w1, b1, gamma, beta, w2, b2 = params
    w2_fold = gamma.reshape(-1, 1) * w2            # (200, 10)
    b2_fold = b2 + beta @ w2                       # (1, 10)
    w2p = jnp.zeros((HIDDEN, OUT_PAD), jnp.float32).at[:, :N_CLASSES].set(w2_fold)
    b2p = jnp.zeros((1, OUT_PAD), jnp.float32).at[:, :N_CLASSES].set(b2_fold)
    return (w1.astype(jnp.bfloat16),
            b1.astype(jnp.float32),
            w2p.astype(jnp.bfloat16),
            b2p.astype(jnp.float32))


def mlp_forward(x_nchw, prepared):
    """x_nchw: (B, 1, 28, 28) float32. Returns (B, 10) float32 logits."""
    w1, b1, w2p, b2p = prepared
    B = x_nchw.shape[0]
    TB = _choose_tb(B)
    grid = (pl.cdiv(B, TB),)

    # Flatten only (free bitcast reshape, row-major, matches torch.flatten).
    # No cast, no pad: the kernel reads f32 and Pallas masks the ragged tail block.
    x = x_nchw.reshape(B, IN_FEATURES)

    flops = 2 * B * (IN_FEATURES * HIDDEN + HIDDEN * OUT_PAD)
    bytes_accessed = (B * IN_FEATURES * 4             # x (f32)
                      + IN_FEATURES * HIDDEN * 2      # w1 (bf16)
                      + HIDDEN * 4                    # b1 (f32)
                      + HIDDEN * OUT_PAD * 2          # w2 folded (bf16)
                      + OUT_PAD * 4                   # b2 folded (f32)
                      + B * OUT_PAD * 2)              # out (bf16)

    out = pl.pallas_call(
        mlp_kernel,
        out_shape=jax.ShapeDtypeStruct((B, OUT_PAD), jnp.bfloat16),
        grid=grid,
        in_specs=[
            pl.BlockSpec((TB, IN_FEATURES), lambda i: (i, 0)),       # x: tiled over batch
            pl.BlockSpec((IN_FEATURES, HIDDEN), lambda i: (0, 0)),   # w1: resident
            pl.BlockSpec((1, HIDDEN), lambda i: (0, 0)),             # b1: resident
            pl.BlockSpec((HIDDEN, OUT_PAD), lambda i: (0, 0)),       # w2 (folded): resident
            pl.BlockSpec((1, OUT_PAD), lambda i: (0, 0)),            # b2 (folded): resident
        ],
        out_specs=pl.BlockSpec((TB, OUT_PAD), lambda i: (i, 0)),
        compiler_params=pltpu.CompilerParams(
            dimension_semantics=("parallel",)),
        cost_estimate=pl.CostEstimate(flops=flops,
                                      transcendentals=B,
                                      bytes_accessed=bytes_accessed),
    )(x, w1, b1, w2p, b2p)

    return out[:, :N_CLASSES].astype(jnp.float32)


def init_params(key):
    """Deterministic synthetic parameters matching the nn.Module shapes.
    Mimics PyTorch's default Linear init: U(-1/sqrt(fan_in), 1/sqrt(fan_in))."""
    k1, k2, k3, k4 = jax.random.split(key, 4)
    bound1 = 1.0 / (IN_FEATURES ** 0.5)
    w1 = jax.random.uniform(k1, (IN_FEATURES, HIDDEN), jnp.float32, -bound1, bound1)
    b1 = jax.random.uniform(k2, (1, HIDDEN), jnp.float32, -bound1, bound1)
    gamma = jnp.ones((1, HIDDEN), jnp.float32)   # LayerNorm weight init
    beta = jnp.zeros((1, HIDDEN), jnp.float32)   # LayerNorm bias init
    bound2 = 1.0 / (HIDDEN ** 0.5)
    w2 = jax.random.uniform(k3, (HIDDEN, N_CLASSES), jnp.float32, -bound2, bound2)
    b2 = jax.random.uniform(k4, (1, N_CLASSES), jnp.float32, -bound2, bound2)
    return (w1, b1, gamma, beta, w2, b2)


def reference_forward_f32(x_nchw, params):
    """Full-f32 reference matching the PyTorch module exactly."""
    w1, b1, gamma, beta, w2, b2 = params
    x = x_nchw.reshape(x_nchw.shape[0], -1)
    h = x @ w1 + b1
    h = jnp.where(h > 0, h, LEAKY_SLOPE * h)
    mean = jnp.mean(h, axis=-1, keepdims=True)
    var = jnp.mean((h - mean) ** 2, axis=-1, keepdims=True)
    h = (h - mean) / jnp.sqrt(var + LN_EPS) * gamma + beta
    return h @ w2 + b2


def reference_forward_kernel_precision(x_nchw, prepared):
    """Reference mirroring the kernel's bf16-weight / f32-accum math
    (without the final bf16 output rounding)."""
    w1, b1, w2p, b2p = prepared
    x = x_nchw.reshape(x_nchw.shape[0], -1).astype(jnp.bfloat16)
    h = jnp.dot(x, w1, preferred_element_type=jnp.float32) + b1
    h = jnp.where(h > 0, h, LEAKY_SLOPE * h)
    mean = jnp.mean(h, axis=-1, keepdims=True)
    c = h - mean
    var = jnp.mean(c * c, axis=-1, keepdims=True)
    h = c * lax.rsqrt(var + LN_EPS)
    out = jnp.dot(h.astype(jnp.bfloat16), w2p,
                  preferred_element_type=jnp.float32) + b2p
    return out[:, :N_CLASSES]


if __name__ == "__main__":
    key = jax.random.PRNGKey(0)
    kx, kp = jax.random.split(key)

    B = 8
    x = jax.random.normal(kx, (B, 1, 28, 28), jnp.float32)  # NCHW, like PyTorch MNIST
    params = init_params(kp)
    prepared = prepare_params(params)

    out = mlp_forward(x, prepared)
    out = jax.block_until_ready(out)
    assert out.shape == (B, N_CLASSES)

    # Tight check against a reference with the same (bf16-weight) precision
    # (allowing for the final bf16 output rounding).
    ref_bf16 = reference_forward_kernel_precision(x, prepared)
    assert jnp.allclose(out, ref_bf16, atol=1e-2, rtol=1e-2), "mismatch vs bf16 reference"

    # Loose check against the exact f32 module semantics (bf16 weight rounding).
    ref_f32 = reference_forward_f32(x, params)
    assert jnp.allclose(out, ref_f32, atol=5e-2, rtol=5e-2), "mismatch vs f32 reference"

    print("KERNEL_OK")
</pallas_src>

<mosaic_0001>
module attributes {stable_mosaic.version = 11 : i64} {
  func.func @mlp_kernel(%arg0: i32, %arg1: memref<8x784xf32, #tpu.memory_space<vmem>>, %arg2: memref<784x200xbf16, #tpu.memory_space<vmem>>, %arg3: memref<1x200xf32, #tpu.memory_space<vmem>>, %arg4: memref<200x128xbf16, #tpu.memory_space<vmem>>, %arg5: memref<1x128xf32, #tpu.memory_space<vmem>>, %arg6: memref<8x128xbf16, #tpu.memory_space<vmem>>) attributes {dimension_semantics = [#tpu.dimension_semantics<parallel>], iteration_bounds = array<i64: 1>, scalar_prefetch = 0 : i64, scratch_operands = 0 : i64, tpu.core_type = #tpu.core_type<tc>, window_params = [{transform_indices = @transform_0, window_bounds = array<i64: 8, 784>}, {pipeline_mode = #tpu.pipeline_mode<synchronous>, transform_indices = @transform_1, window_bounds = array<i64: 784, 200>}, {pipeline_mode = #tpu.pipeline_mode<synchronous>, transform_indices = @transform_2, window_bounds = array<i64: 1, 200>}, {pipeline_mode = #tpu.pipeline_mode<synchronous>, transform_indices = @transform_3, window_bounds = array<i64: 200, 128>}, {pipeline_mode = #tpu.pipeline_mode<synchronous>, transform_indices = @transform_4, window_bounds = array<i64: 1, 128>}, {transform_indices = @transform_5, window_bounds = array<i64: 8, 128>}]} {
    %c0 = arith.constant 0 : index
    %c0_0 = arith.constant 0 : index
    %0 = vector.load %arg1[%c0, %c0_0] : memref<8x784xf32, #tpu.memory_space<vmem>>, vector<8x784xf32>
    %1 = arith.truncf %0 : vector<8x784xf32> to vector<8x784xbf16>
    %c0_1 = arith.constant 0 : index
    %c0_2 = arith.constant 0 : index
    %2 = vector.load %arg2[%c0_1, %c0_2] : memref<784x200xbf16, #tpu.memory_space<vmem>>, vector<784x200xbf16>
    %cst = arith.constant dense<0.000000e+00> : vector<8x200xf32>
    %3 = tpu.matmul %1, %2, %cst {dimension_numbers = #tpu.dot_dimension_numbers<[1], [0], [0], [1], [0, 0, 1, 1], [], []>} : vector<8x784xbf16>, vector<784x200xbf16>, vector<8x200xf32> -> vector<8x200xf32>
    %c0_3 = arith.constant 0 : index
    %c0_4 = arith.constant 0 : index
    %4 = vector.load %arg3[%c0_3, %c0_4] : memref<1x200xf32, #tpu.memory_space<vmem>>, vector<1x200xf32>
    %5 = vector.broadcast %4 : vector<1x200xf32> to vector<8x200xf32>
    %6 = arith.addf %3, %5 : vector<8x200xf32>
    %cst_5 = arith.constant 0.000000e+00 : f32
    %7 = vector.broadcast %cst_5 : f32 to vector<8x200xf32>
    %8 = arith.cmpf ogt, %6, %7 : vector<8x200xf32>
    %cst_6 = arith.constant 0.00999999977 : f32
    %9 = vector.broadcast %cst_6 : f32 to vector<8x200xf32>
    %10 = arith.mulf %9, %6 : vector<8x200xf32>
    %11 = arith.select %8, %6, %10 : vector<8x200xi1>, vector<8x200xf32>
    %cst_7 = arith.constant dense<0.000000e+00> : vector<8xf32>
    %12 = vector.multi_reduction <add>, %11, %cst_7 [1] : vector<8x200xf32> to vector<8xf32>
    %13 = vector.shape_cast %12 : vector<8xf32> to vector<8x1xf32>
    %cst_8 = arith.constant 2.000000e+02 : f32
    %14 = vector.broadcast %cst_8 : f32 to vector<8x1xf32>
    %15 = arith.divf %13, %14 : vector<8x1xf32>
    %16 = vector.broadcast %15 : vector<8x1xf32> to vector<8x200xf32>
    %17 = arith.subf %11, %16 : vector<8x200xf32>
    %18 = arith.mulf %17, %17 : vector<8x200xf32>
    %cst_9 = arith.constant dense<0.000000e+00> : vector<8xf32>
    %19 = vector.multi_reduction <add>, %18, %cst_9 [1] : vector<8x200xf32> to vector<8xf32>
    %20 = vector.shape_cast %19 : vector<8xf32> to vector<8x1xf32>
    %cst_10 = arith.constant 2.000000e+02 : f32
    %21 = vector.broadcast %cst_10 : f32 to vector<8x1xf32>
    %22 = arith.divf %20, %21 : vector<8x1xf32>
    %cst_11 = arith.constant 9.99999974E-6 : f32
    %23 = vector.broadcast %cst_11 : f32 to vector<8x1xf32>
    %24 = arith.addf %22, %23 : vector<8x1xf32>
    %25 = math.rsqrt %24 : vector<8x1xf32>
    %26 = vector.broadcast %25 : vector<8x1xf32> to vector<8x200xf32>
    %27 = arith.mulf %17, %26 : vector<8x200xf32>
    %28 = arith.truncf %27 : vector<8x200xf32> to vector<8x200xbf16>
    %c0_12 = arith.constant 0 : index
    %c0_13 = arith.constant 0 : index
    %29 = vector.load %arg4[%c0_12, %c0_13] : memref<200x128xbf16, #tpu.memory_space<vmem>>, vector<200x128xbf16>
    %cst_14 = arith.constant dense<0.000000e+00> : vector<8x128xf32>
    %30 = tpu.matmul %28, %29, %cst_14 {dimension_numbers = #tpu.dot_dimension_numbers<[1], [0], [0], [1], [0, 0, 1, 1], [], []>} : vector<8x200xbf16>, vector<200x128xbf16>, vector<8x128xf32> -> vector<8x128xf32>
    %c0_15 = arith.constant 0 : index
    %c0_16 = arith.constant 0 : index
    %31 = vector.load %arg5[%c0_15, %c0_16] : memref<1x128xf32, #tpu.memory_space<vmem>>, vector<1x128xf32>
    %32 = vector.broadcast %31 : vector<1x128xf32> to vector<8x128xf32>
    %33 = arith.addf %30, %32 : vector<8x128xf32>
    %34 = arith.truncf %33 : vector<8x128xf32> to vector<8x128xbf16>
    %c0_17 = arith.constant 0 : index
    %c0_18 = arith.constant 0 : index
    %35 = vector.load %arg6[%c0_17, %c0_18] : memref<8x128xbf16, #tpu.memory_space<vmem>>, vector<8x128xbf16>
    tpu.vector_store %arg6[%c0_17, %c0_18], %34 {strides = array<i32>} : memref<8x128xbf16, #tpu.memory_space<vmem>>, vector<8x128xbf16>,
    return
  }
  func.func @transform_0(%arg0: i32) -> (i32, i32) {
    %c0_i32 = arith.constant 0 : i32
    %c0_i32_0 = arith.constant 0 : i32
    return %arg0, %c0_i32 : i32, i32
  }
  func.func @transform_1(%arg0: i32) -> (i32, i32) {
    %c0_i32 = arith.constant 0 : i32
    %c0_i32_0 = arith.constant 0 : i32
    %c0_i32_1 = arith.constant 0 : i32
    return %c0_i32, %c0_i32_0 : i32, i32
  }
  func.func @transform_2(%arg0: i32) -> (i32, i32) {
    %c0_i32 = arith.constant 0 : i32
    %c0_i32_0 = arith.constant 0 : i32
    %c0_i32_1 = arith.constant 0 : i32
    return %c0_i32, %c0_i32_0 : i32, i32
  }
  func.func @transform_3(%arg0: i32) -> (i32, i32) {
    %c0_i32 = arith.constant 0 : i32
    %c0_i32_0 = arith.constant 0 : i32
    %c0_i32_1 = arith.constant 0 : i32
    return %c0_i32, %c0_i32_0 : i32, i32
  }
  func.func @transform_4(%arg0: i32) -> (i32, i32) {
    %c0_i32 = arith.constant 0 : i32
    %c0_i32_0 = arith.constant 0 : i32
    %c0_i32_1 = arith.constant 0 : i32
    return %c0_i32, %c0_i32_0 : i32, i32
  }
  func.func @transform_5(%arg0: i32) -> (i32, i32) {
    %c0_i32 = arith.constant 0 : i32
    %c0_i32_0 = arith.constant 0 : i32
    return %arg0, %c0_i32 : i32, i32
  }
}

</mosaic_0001>

<bundles_post_ra>
// kernel: tpu_custom_call.1
= control target key start
LH: loop header
LB: loop body
LE: loop exit
PB: predicated region body
PF: predicated region fallthrough
CT: control target
= control target key end

     0   :  { %vm630_vm0 = vcmask 130048   ;;  %s2322_s0 = inlined_call_operand.vmem [shape: f32[8,784], index: 0, kind: input, shape index: {}]   ;;  %s2323_s1 = inlined_call_operand.vmem [shape: bf16[784,200], index: 1, kind: input, shape index: {}]   ;;  %s2324_s2 = inlined_call_operand.vmem [shape: f32[1,200], index: 2, kind: input, shape index: {}]   ;;  %s2325_s3 = inlined_call_operand.vmem [shape: bf16[200,128], index: 3, kind: input, shape index: {}]   ;;  %s2326_s4 = inlined_call_operand.vmem [shape: f32[1,128], index: 4, kind: input, shape index: {}]   ;;  %s2327_s5 = inlined_call_operand.hbm [shape: bf16[8,128], index: 5, kind: output, shape index: {}]  }
   0x1   :  { %v1072_v0 = vld [vmem:[%s2323_s1 + $0x70] sm:$0xf]  ;;  %v1472_v1 = vld [vmem:[%s2323_s1 + $0x74] sm:$0xf0]  ;;  %v1064_v11 = vld [vmem:[%s2323_s1 + $0x60] sm:$0xf] }
   0x2   :  { %v1200_v2 = vld [vmem:[%s2323_s1 + $0x170] sm:$0xf]  ;;  %v1073_v3 = vor.u32 %v1472_v1, %v1072_v0  ;;  %v1504_v4 = vld [vmem:[%s2323_s1 + $0x174] sm:$0xf0]  ;;  %v1470_v13 = vld [vmem:[%s2323_s1 + $0x64] sm:$0xf0] }
   0x3   :  { %v1264_v5 = vld [vmem:[%s2323_s1 + $0x1f0] sm:$0xf]  ;;  %v1520_v6 = vld [vmem:[%s2323_s1 + $0x1f4] sm:$0xf0]  ;;  %v1201_v7 = vor.u32 %v1504_v4, %v1200_v2  ;;  %v1192_v14 = vld [vmem:[%s2323_s1 + $0x160] sm:$0xf]  ;;  %v1065_v16 = vor.u32 %v1470_v13, %v1064_v11 }
   0x4   :  { %v1265_v8 = vor.u32 %v1520_v6, %v1264_v5  ;;  %v1136_v9 = vld [vmem:[%s2323_s1 + $0xf0] sm:$0xf]  ;;  %v1488_v10 = vld [vmem:[%s2323_s1 + $0xf4] sm:$0xf0]  ;;  %634 = vmatpush.bf16.msra.mxu0 %v1073_v3  ;;  %v1502_v15 = vld [vmem:[%s2323_s1 + $0x164] sm:$0xf0] }
   0x5   :  { %v1137_v12 = vor.u32 %v1488_v10, %v1136_v9  ;;  %660 = vmatpush.bf16.msra.mxu2 %v1201_v7  ;;  %v1193_v17 = vor.u32 %v1502_v15, %v1192_v14  ;;  %v1256_v18 = vld [vmem:[%s2323_s1 + $0x1e0] sm:$0xf]  ;;  %v1518_v19 = vld [vmem:[%s2323_s1 + $0x1e4] sm:$0xf0]  ;;  %v1056_v23 = vld [vmem:[%s2323_s1 + $0x50] sm:$0xf] }
   0x6   :  { %673 = vmatpush.bf16.msra.mxu3 %v1265_v8  ;;  %v1128_v20 = vld [vmem:[%s2323_s1 + $0xe0] sm:$0xf]  ;;  %v1257_v21 = vor.u32 %v1518_v19, %v1256_v18  ;;  %v1486_v22 = vld [vmem:[%s2323_s1 + $0xe4] sm:$0xf0]  ;;  %v1468_v24 = vld [vmem:[%s2323_s1 + $0x54] sm:$0xf0] }
   0x7   :  { %647 = vmatpush.bf16.msra.mxu1 %v1137_v12  ;;  %v1129_v25 = vor.u32 %v1486_v22, %v1128_v20  ;;  %v1184_v26 = vld [vmem:[%s2323_s1 + $0x150] sm:$0xf]  ;;  %v1500_v27 = vld [vmem:[%s2323_s1 + $0x154] sm:$0xf0]  ;;  %v1057_v29 = vor.u32 %v1468_v24, %v1056_v23  ;;  %v1048_v35 = vld [vmem:[%s2323_s1 + $0x40] sm:$0xf] }
   0x8   :  { %v1248_v28 = vld [vmem:[%s2323_s1 + $0x1d0] sm:$0xf]  ;;  %635 = vmatpush.bf16.msra.mxu0 %v1065_v16  ;;  %v1516_v30 = vld [vmem:[%s2323_s1 + $0x1d4] sm:$0xf0]  ;;  %v1185_v33 = vor.u32 %v1500_v27, %v1184_v26  ;;  %v1466_v36 = vld [vmem:[%s2323_s1 + $0x44] sm:$0xf0] }
   0x9   :  { %v1120_v31 = vld [vmem:[%s2323_s1 + $0xd0] sm:$0xf]  ;;  %v1484_v32 = vld [vmem:[%s2323_s1 + $0xd4] sm:$0xf0]  ;;  %661 = vmatpush.bf16.msra.mxu2 %v1193_v17  ;;  %v1249_v34 = vor.u32 %v1516_v30, %v1248_v28  ;;  %v1176_v37 = vld [vmem:[%s2323_s1 + $0x140] sm:$0xf]  ;;  %v1049_v44 = vor.u32 %v1466_v36, %v1048_v35 }
   0xa   :  { %674 = vmatpush.bf16.msra.mxu3 %v1257_v21  ;;  %v1121_v38 = vor.u32 %v1484_v32, %v1120_v31  ;;  %v1498_v39 = vld [vmem:[%s2323_s1 + $0x144] sm:$0xf0]  ;;  %v1240_v40 = vld [vmem:[%s2323_s1 + $0x1c0] sm:$0xf]  ;;  %v1040_v47 = vld [vmem:[%s2323_s1 + $0x30] sm:$0xf] }
   0xb   :  { %648 = vmatpush.bf16.msra.mxu1 %v1129_v25  ;;  %v1514_v41 = vld [vmem:[%s2323_s1 + $0x1c4] sm:$0xf0]  ;;  %v1112_v42 = vld [vmem:[%s2323_s1 + $0xc0] sm:$0xf]  ;;  %v1177_v45 = vor.u32 %v1498_v39, %v1176_v37  ;;  %v1464_v48 = vld [vmem:[%s2323_s1 + $0x34] sm:$0xf0] }
   0xc   :  { %v1482_v43 = vld [vmem:[%s2323_s1 + $0xc4] sm:$0xf0]  ;;  %636 = vmatpush.bf16.msra.mxu0 %v1057_v29  ;;  %v1241_v46 = vor.u32 %v1514_v41, %v1240_v40  ;;  %v1168_v49 = vld [vmem:[%s2323_s1 + $0x130] sm:$0xf]  ;;  %v1496_v51 = vld [vmem:[%s2323_s1 + $0x134] sm:$0xf0]  ;;  %v1041_v56 = vor.u32 %v1464_v48, %v1040_v47 }
   0xd   :  { %662 = vmatpush.bf16.msra.mxu2 %v1185_v33  ;;  %v1113_v50 = vor.u32 %v1482_v43, %v1112_v42  ;;  %v1232_v52 = vld [vmem:[%s2323_s1 + $0x1b0] sm:$0xf]  ;;  %v1512_v53 = vld [vmem:[%s2323_s1 + $0x1b4] sm:$0xf0]  ;;  %v1169_v57 = vor.u32 %v1496_v51, %v1168_v49  ;;  %v1032_v59 = vld [vmem:[%s2323_s1 + $0x20] sm:$0xf] }
   0xe   :  { %675 = vmatpush.bf16.msra.mxu3 %v1249_v34  ;;  %v1104_v54 = vld [vmem:[%s2323_s1 + $0xb0] sm:$0xf]  ;;  %v1480_v55 = vld [vmem:[%s2323_s1 + $0xb4] sm:$0xf0]  ;;  %v1233_v58 = vor.u32 %v1512_v53, %v1232_v52  ;;  %v1462_v60 = vld [vmem:[%s2323_s1 + $0x24] sm:$0xf0] }
   0xf   :  { %649 = vmatpush.bf16.msra.mxu1 %v1121_v38  ;;  %v1160_v61 = vld [vmem:[%s2323_s1 + $0x120] sm:$0xf]  ;;  %v1105_v62 = vor.u32 %v1480_v55, %v1104_v54  ;;  %v1494_v63 = vld [vmem:[%s2323_s1 + $0x124] sm:$0xf0]  ;;  %v1033_v4 = vor.u32 %v1462_v60, %v1032_v59  ;;  %v1024_v7 = vld [vmem:[%s2323_s1 + $0x10] sm:$0xf] }
  0x10   :  { %637 = vmatpush.bf16.msra.mxu0 %v1049_v44  ;;  %v1224_v0 = vld [vmem:[%s2323_s1 + $0x1a0] sm:$0xf]  ;;  %v1510_v1 = vld [vmem:[%s2323_s1 + $0x1a4] sm:$0xf0]  ;;  %v1161_v5 = vor.u32 %v1494_v63, %v1160_v61  ;;  %v1460_v8 = vld [vmem:[%s2323_s1 + $0x14] sm:$0xf0] }
  0x11   :  { %663 = vmatpush.bf16.msra.mxu2 %v1177_v45  ;;  %v1096_v2 = vld [vmem:[%s2323_s1 + $0xa0] sm:$0xf]  ;;  %v1478_v3 = vld [vmem:[%s2323_s1 + $0xa4] sm:$0xf0]  ;;  %v1225_v6 = vor.u32 %v1510_v1, %v1224_v0  ;;  %v1152_v9 = vld [vmem:[%s2323_s1 + $0x110] sm:$0xf]  ;;  %v1025_v16 = vor.u32 %v1460_v8, %v1024_v7 }
  0x12   :  { %676 = vmatpush.bf16.msra.mxu3 %v1241_v46  ;;  %v1097_v10 = vor.u32 %v1478_v3, %v1096_v2  ;;  %v1492_v11 = vld [vmem:[%s2323_s1 + $0x114] sm:$0xf0]  ;;  %v1216_v12 = vld [vmem:[%s2323_s1 + $0x190] sm:$0xf]  ;;  %v1016_v17 = vld [vmem:[%s2323_s1] sm:$0xf] }
  0x13   :  { %650 = vmatpush.bf16.msra.mxu1 %v1113_v50  ;;  %v1508_v13 = vld [vmem:[%s2323_s1 + $0x194] sm:$0xf0]  ;;  %v1088_v14 = vld [vmem:[%s2323_s1 + $0x90] sm:$0xf]  ;;  %v1458_v18 = vld [vmem:[%s2323_s1 + $0x4] sm:$0xf0]  ;;  %v1153_v20 = vor.u32 %v1492_v11, %v1152_v9 }
  0x14   :  { %638 = vmatpush.bf16.msra.mxu0 %v1041_v56  ;;  %v1476_v15 = vld [vmem:[%s2323_s1 + $0x94] sm:$0xf0]  ;;  %v1144_v19 = vld [vmem:[%s2323_s1 + $0x100] sm:$0xf]  ;;  %v1217_v21 = vor.u32 %v1508_v13, %v1216_v12  ;;  %v1490_v22 = vld [vmem:[%s2323_s1 + $0x104] sm:$0xf0]  ;;  %v1017_v32 = vor.u32 %v1458_v18, %v1016_v17 }
  0x15   :  { %664 = vmatpush.bf16.msra.mxu2 %v1169_v57  ;;  %v1208_v23 = vld [vmem:[%s2323_s1 + $0x180] sm:$0xf]  ;;  %v1506_v24 = vld [vmem:[%s2323_s1 + $0x184] sm:$0xf0]  ;;  %v1089_v25 = vor.u32 %v1476_v15, %v1088_v14  ;;  %v1328_v26 = vld [vmem:[%s2323_s1 + $0x270] sm:$0xf]  ;;  %v1145_v36 = vor.u32 %v1490_v22, %v1144_v19 }
  0x16   :  { %677 = vmatpush.bf16.msra.mxu3 %v1233_v58  ;;  %v1536_v27 = vld [vmem:[%s2323_s1 + $0x274] sm:$0xf0]  ;;  %v1471_v28 = vld [vmem:[%s2323_s1 + $0x74] sm:$0xf]  ;;  %v1074_v29 = vld [vmem:[%s2323_s1 + $0x78] sm:$0xf0]  ;;  %v1209_v37 = vor.u32 %v1506_v24, %v1208_v23 }
  0x17   :  { %651 = vmatpush.bf16.msra.mxu1 %v1105_v62  ;;  %v1080_v30 = vld [vmem:[%s2323_s1 + $0x80] sm:$0xf]  ;;  %v1474_v31 = vld [vmem:[%s2323_s1 + $0x84] sm:$0xf0]  ;;  %v24_v33 = vld [vmem:[%s2322_s0 + $0x10] sm:$0xff]  ;;  %v1329_v41 = vor.u32 %v1536_v27, %v1328_v26  ;;  %v1077_v42 = vor.u32 %v1471_v28, %v1074_v29 }
  0x18   :  { %639 = vmatpush.bf16.msra.mxu0 %v1033_v4  ;;  %v1400_v34 = vld [vmem:[%s2323_s1 + $0x300] sm:$0xf]  ;;  %v1554_v35 = vld [vmem:[%s2323_s1 + $0x304] sm:$0xf0]  ;;  %v1392_v38 = vld [vmem:[%s2323_s1 + $0x2f0] sm:$0xf]  ;;  %v1081_v46 = vor.u32 %v1474_v31, %v1080_v30  ;;  %v1872_v51 = vpack.c.bf16 %v24_v33, %v24_v33 }
  0x19   :  { %665 = vmatpush.bf16.msra.mxu2 %v1161_v5  ;;  %v1552_v39 = vld [vmem:[%s2323_s1 + $0x2f4] sm:$0xf0]  ;;  %v1487_v40 = vld [vmem:[%s2323_s1 + $0xf4] sm:$0xf]  ;;  %v1138_v43 = vld [vmem:[%s2323_s1 + $0xf8] sm:$0xf0]  ;;  %v1401_v47 = vor.u32 %v1554_v35, %v1400_v34 }
  0x1a   :  { %678 = vmatpush.bf16.msra.mxu3 %v1225_v6  ;;  %v1320_v44 = vld [vmem:[%s2323_s1 + $0x260] sm:$0xf]  ;;  %v1534_v48 = vld [vmem:[%s2323_s1 + $0x264] sm:$0xf0]  ;;  %v1469_v49 = vld [vmem:[%s2323_s1 + $0x64] sm:$0xf]  ;;  %v1393_v52 = vor.u32 %v1552_v39, %v1392_v38  ;;  %v1141_v55 = vor.u32 %v1487_v40, %v1138_v43 }
  0x1b   :  { %652 = vmatpush.bf16.msra.mxu1 %v1097_v10  ;;  %v22_v45 = vld [vmem:[%s2322_s0] sm:$0xff]  ;;  %v1066_v50 = vld [vmem:[%s2323_s1 + $0x68] sm:$0xf0]  ;;  %v25_v53 = vld [vmem:[%s2322_s0 + $0x18] sm:$0xff]  ;;  %v1321_v59 = vor.u32 %v1534_v48, %v1320_v44 }
  0x1c   :  { %640 = vmatpush.bf16.msra.mxu0 %v1025_v16  ;;  %v23_v54 = vld [vmem:[%s2322_s0 + $0x8] sm:$0xff]  ;;  %v1384_v56 = vld [vmem:[%s2323_s1 + $0x2e0] sm:$0xf]  ;;  %v1886_v58 = vpack.c.bf16 %v22_v45, %v22_v45  ;;  %v1069_v60 = vor.u32 %v1469_v49, %v1066_v50  ;;  %v1485_v61 = vld [vmem:[%s2323_s1 + $0xe4] sm:$0xf]  ;;  %v1906_v3 = vpack.c.bf16 %v25_v53, %v25_v53 }
  0x1d   :  { %666 = vmatpush.bf16.msra.mxu2 %v1153_v20  ;;  %v1550_v57 = vld [vmem:[%s2323_s1 + $0x2e4] sm:$0xf0]  ;;  %v1130_v62 = vld [vmem:[%s2323_s1 + $0xe8] sm:$0xf0]  ;;  %v1312_v63 = vld [vmem:[%s2323_s1 + $0x250] sm:$0xf]  ;;  %v1908_v4 = vpack.c.bf16 %v23_v54, %v23_v54 }
  0x1e   :  { %679 = vmatpush.bf16.msra.mxu3 %v1217_v21  ;;  %v1532_v0 = vld [vmem:[%s2323_s1 + $0x254] sm:$0xf0]  ;;  %v1467_v1 = vld [vmem:[%s2323_s1 + $0x54] sm:$0xf]  ;;  %v1058_v2 = vld [vmem:[%s2323_s1 + $0x58] sm:$0xf0]  ;;  %v1385_v5 = vor.u32 %v1550_v57, %v1384_v56  ;;  %v1133_v6 = vor.u32 %v1485_v61, %v1130_v62 }
  0x1f   :  { %653 = vmatpush.bf16.msra.mxu1 %v1089_v25  ;;  %v1376_v7 = vld [vmem:[%s2323_s1 + $0x2d0] sm:$0xf]  ;;  %v1548_v8 = vld [vmem:[%s2323_s1 + $0x2d4] sm:$0xf0]  ;;  %v1313_v9 = vor.u32 %v1532_v0, %v1312_v63  ;;  %v1061_v10 = vor.u32 %v1467_v1, %v1058_v2  ;;  %v1483_v11 = vld [vmem:[%s2323_s1 + $0xd4] sm:$0xf] }
  0x20   :  { %641 = vmatpush.bf16.msra.mxu0 %v1017_v32  ;;  %v1122_v12 = vld [vmem:[%s2323_s1 + $0xd8] sm:$0xf0]  ;;  %v1304_v13 = vld [vmem:[%s2323_s1 + $0x240] sm:$0xf]  ;;  %v1530_v14 = vld [vmem:[%s2323_s1 + $0x244] sm:$0xf0]  ;;  %v1377_v17 = vor.u32 %v1548_v8, %v1376_v7 }
  0x21   :  { %667 = vmatpush.bf16.msra.mxu2 %v1145_v36  ;;  %v1465_v15 = vld [vmem:[%s2323_s1 + $0x44] sm:$0xf]  ;;  %v1050_v16 = vld [vmem:[%s2323_s1 + $0x48] sm:$0xf0]  ;;  %v1125_v18 = vor.u32 %v1483_v11, %v1122_v12  ;;  %v1368_v19 = vld [vmem:[%s2323_s1 + $0x2c0] sm:$0xf]  ;;  %v1305_v21 = vor.u32 %v1530_v14, %v1304_v13 }
  0x22   :  { %680 = vmatpush.bf16.msra.mxu3 %v1209_v37  ;;  %v1546_v20 = vld [vmem:[%s2323_s1 + $0x2c4] sm:$0xf0]  ;;  %v1053_v22 = vor.u32 %v1465_v15, %v1050_v16  ;;  %v1481_v23 = vld [vmem:[%s2323_s1 + $0xc4] sm:$0xf]  ;;  %v1114_v24 = vld [vmem:[%s2323_s1 + $0xc8] sm:$0xf0] }
  0x23   :  { %654 = vmatpush.bf16.msra.mxu1 %v1081_v46  ;;  %642 = vmatmul.bf16.vlgmr.msra.gmra.mxu0 %v1886_v58  ;;  %v1296_v25 = vld [vmem:[%s2323_s1 + $0x230] sm:$0xf]  ;;  %v1528_v26 = vld [vmem:[%s2323_s1 + $0x234] sm:$0xf0]  ;;  %v1463_v27 = vld [vmem:[%s2323_s1 + $0x34] sm:$0xf]  ;;  %v1369_v29 = vor.u32 %v1546_v20, %v1368_v19  ;;  %v1117_v30 = vor.u32 %v1481_v23, %v1114_v24 }
  0x24   :  { %686 = vmatpush.bf16.msrb.mxu0 %v1329_v41  ;;  %668 = vmatmul.bf16.vlgmr.msra.gmra.mxu2 %v1872_v51  ;;  %v1042_v28 = vld [vmem:[%s2323_s1 + $0x38] sm:$0xf0]  ;;  %v1360_v31 = vld [vmem:[%s2323_s1 + $0x2b0] sm:$0xf]  ;;  %v1544_v32 = vld [vmem:[%s2323_s1 + $0x2b4] sm:$0xf0]  ;;  %v1297_v34 = vor.u32 %v1528_v26, %v1296_v25 }
  0x25   :  { %719 = vmatpush.bf16.msrb.mxu2 %v1401_v47  ;;  %681 = vmatmul.bf16.vlgmr.msra.gmra.mxu3 %v1906_v3  ;;  %v28_v33 = vld [vmem:[%s2322_s0 + $0x30] sm:$0xff]  ;;  %v1045_v35 = vor.u32 %v1463_v27, %v1042_v28  ;;  %v1106_v37 = vld [vmem:[%s2323_s1 + $0xb8] sm:$0xf0]  ;;  %v1288_v38 = vld [vmem:[%s2323_s1 + $0x220] sm:$0xf] }
  0x26   :  { %725 = vmatpush.bf16.msrb.mxu3 %v1077_v42  ;;  %655 = vmatmul.bf16.vlgmr.msra.gmra.mxu1 %v1908_v4  ;;  %v1479_v36 = vld [vmem:[%s2323_s1 + $0xb4] sm:$0xf]  ;;  %v1526_v39 = vld [vmem:[%s2323_s1 + $0x224] sm:$0xf0]  ;;  %v1461_v40 = vld [vmem:[%s2323_s1 + $0x24] sm:$0xf]  ;;  %v1361_v42 = vor.u32 %v1544_v32, %v1360_v31  ;;  %v1989_v43 = vpack.c.bf16 %v28_v33, %v28_v33 }
  0x27   :  { %699 = vmatpush.bf16.msrb.mxu1 %v1393_v52  ;;  %v1034_v41 = vld [vmem:[%s2323_s1 + $0x28] sm:$0xf0]  ;;  %v1109_v44 = vor.u32 %v1479_v36, %v1106_v37  ;;  %v1352_v45 = vld [vmem:[%s2323_s1 + $0x2a0] sm:$0xf]  ;;  %v1542_v46 = vld [vmem:[%s2323_s1 + $0x2a4] sm:$0xf0]  ;;  %v1289_v47 = vor.u32 %v1526_v39, %v1288_v38 }
  0x28   :  { %687 = vmatpush.bf16.msrb.mxu0 %v1321_v59  ;;  %v1037_v48 = vor.u32 %v1461_v40, %v1034_v41  ;;  %v1477_v49 = vld [vmem:[%s2323_s1 + $0xa4] sm:$0xf]  ;;  %v1098_v50 = vld [vmem:[%s2323_s1 + $0xa8] sm:$0xf0]  ;;  %v1280_v52 = vld [vmem:[%s2323_s1 + $0x210] sm:$0xf]  ;;  %v1353_v56 = vor.u32 %v1542_v46, %v1352_v45 }
  0x29   :  { %738 = vmatpush.bf16.msra.mxu2 %v1141_v55  ;;  %v1524_v53 = vld [vmem:[%s2323_s1 + $0x214] sm:$0xf0]  ;;  %v1459_v54 = vld [vmem:[%s2323_s1 + $0x14] sm:$0xf]  ;;  %v1026_v55 = vld [vmem:[%s2323_s1 + $0x18] sm:$0xf0]  ;;  %v1101_v57 = vor.u32 %v1477_v49, %v1098_v50 }
  0x2a   :  { %726 = vmatpush.bf16.msrb.mxu3 %v1069_v60  ;;  %v1344_v59 = vld [vmem:[%s2323_s1 + $0x290] sm:$0xf]  ;;  %v1540_v60 = vld [vmem:[%s2323_s1 + $0x294] sm:$0xf0]  ;;  %v1475_v61 = vld [vmem:[%s2323_s1 + $0x94] sm:$0xf]  ;;  %v1281_v62 = vor.u32 %v1524_v53, %v1280_v52  ;;  %v1029_v63 = vor.u32 %v1459_v54, %v1026_v55 }
  0x2b   :  { %700 = vmatpush.bf16.msrb.mxu1 %v1385_v5  ;;  %v1090_v0 = vld [vmem:[%s2323_s1 + $0x98] sm:$0xf0]  ;;  %v1272_v1 = vld [vmem:[%s2323_s1 + $0x200] sm:$0xf]  ;;  %v1522_v2 = vld [vmem:[%s2323_s1 + $0x204] sm:$0xf0]  ;;  %v1345_v8 = vor.u32 %v1540_v60, %v1344_v59 }
  0x2c   :  { %688 = vmatpush.bf16.msrb.mxu0 %v1313_v9  ;;  %v1457_v5 = vld [vmem:[%s2323_s1 + $0x4] sm:$0xf]  ;;  %v1503_v7 = vld [vmem:[%s2323_s1 + $0x174] sm:$0xf]  ;;  %v1202_v9 = vld [vmem:[%s2323_s1 + $0x178] sm:$0xf0]  ;;  %v1093_v12 = vor.u32 %v1475_v61, %v1090_v0  ;;  %v1273_v16 = vor.u32 %v1522_v2, %v1272_v1 }
  0x2d   :  { %739 = vmatpush.bf16.msra.mxu2 %v1133_v6  ;;  %v1018_v6 = vld [vmem:[%s2323_s1 + $0x8] sm:$0xf0]  ;;  %v1330_v11 = vld [vmem:[%s2323_s1 + $0x278] sm:$0xf0]  ;;  %v1336_v13 = vld [vmem:[%s2323_s1 + $0x280] sm:$0xf] }
  0x2e   :  { %727 = vmatpush.bf16.msrb.mxu3 %v1061_v10  ;;  %v1535_v10 = vld [vmem:[%s2323_s1 + $0x274] sm:$0xf]  ;;  %v1538_v14 = vld [vmem:[%s2323_s1 + $0x284] sm:$0xf0]  ;;  %v26_v15 = vld [vmem:[%s2322_s0 + $0x20] sm:$0xff] }
  0x2f   :  { %701 = vmatpush.bf16.msrb.mxu1 %v1377_v17  ;;  %v1021_v17 = vor.u32 %v1457_v5, %v1018_v6  ;;  %v1082_v19 = vld [vmem:[%s2323_s1 + $0x88] sm:$0xf0]  ;;  %v1519_v20 = vld [vmem:[%s2323_s1 + $0x1f4] sm:$0xf]  ;;  %v1266_v23 = vld [vmem:[%s2323_s1 + $0x1f8] sm:$0xf0]  ;;  %v1337_v26 = vor.u32 %v1538_v14, %v1336_v13 }
  0x30   :  { %689 = vmatpush.bf16.msrb.mxu0 %v1305_v21  ;;  %v1205_v21 = vor.u32 %v1503_v7, %v1202_v9  ;;  %v1551_v24 = vld [vmem:[%s2323_s1 + $0x2f4] sm:$0xf]  ;;  %v1394_v25 = vld [vmem:[%s2323_s1 + $0x2f8] sm:$0xf0]  ;;  %v27_v27 = vld [vmem:[%s2322_s0 + $0x28] sm:$0xff] }
  0x31   :  { %740 = vmatpush.bf16.msra.mxu2 %v1125_v18  ;;  %v1473_v18 = vld [vmem:[%s2323_s1 + $0x84] sm:$0xf]  ;;  %v1322_v33 = vld [vmem:[%s2323_s1 + $0x268] sm:$0xf0]  ;;  %v2100_v37 = vpack.c.bf16 %v27_v27, %v27_v27  ;;  %v1186_v45 = vld [vmem:[%s2323_s1 + $0x158] sm:$0xf0] }
  0x32   :  { %728 = vmatpush.bf16.msrb.mxu3 %v1053_v22  ;;  %v1333_v22 = vor.u32 %v1535_v10, %v1330_v11  ;;  %v1501_v28 = vld [vmem:[%s2323_s1 + $0x164] sm:$0xf]  ;;  %v1085_v31 = vor.u32 %v1473_v18, %v1082_v19  ;;  %v1258_v39 = vld [vmem:[%s2323_s1 + $0x1e8] sm:$0xf0]  ;;  %v1531_v46 = vld [vmem:[%s2323_s1 + $0x254] sm:$0xf] }
  0x33   :  { %702 = vmatpush.bf16.msrb.mxu1 %v1369_v29  ;;  %v1194_v29 = vld [vmem:[%s2323_s1 + $0x168] sm:$0xf0]  ;;  %v1533_v32 = vld [vmem:[%s2323_s1 + $0x264] sm:$0xf]  ;;  %v1515_v50 = vld [vmem:[%s2323_s1 + $0x1d4] sm:$0xf] }
  0x34   :  { %690 = vmatpush.bf16.msrb.mxu0 %v1297_v34  ;;  %1406 = vmatmul.msk.bf16.vlgmr.msrb.gmra.mxu2 %vm630_vm0, %v1989_v43  ;;  %v1269_v34 = vor.u32 %v1519_v20, %v1266_v23  ;;  %v1517_v36 = vld [vmem:[%s2323_s1 + $0x1e4] sm:$0xf]  ;;  %v1197_v38 = vor.u32 %v1501_v28, %v1194_v29  ;;  %v1386_v41 = vld [vmem:[%s2323_s1 + $0x2e8] sm:$0xf0]  ;;  %v1250_v53 = vld [vmem:[%s2323_s1 + $0x1d8] sm:$0xf0] }
  0x35   :  { %741 = vmatpush.bf16.msra.mxu2 %v1117_v30  ;;  %v2089_v30 = vpack.c.bf16 %v26_v15, %v26_v15  ;;  %v1549_v40 = vld [vmem:[%s2323_s1 + $0x2e4] sm:$0xf]  ;;  %v1547_v54 = vld [vmem:[%s2323_s1 + $0x2d4] sm:$0xf]  ;;  %v1378_v55 = vld [vmem:[%s2323_s1 + $0x2d8] sm:$0xf0] }
  0x36   :  { %729 = vmatpush.bf16.msrb.mxu3 %v1045_v35  ;;  %v1397_v35 = vor.u32 %v1551_v24, %v1394_v25  ;;  %v1389_v49 = vor.u32 %v1549_v40, %v1386_v41  ;;  %v1178_v59 = vld [vmem:[%s2323_s1 + $0x148] sm:$0xf0]  ;;  %v1529_v60 = vld [vmem:[%s2323_s1 + $0x244] sm:$0xf] }
  0x37   :  { %703 = vmatpush.bf16.msrb.mxu1 %v1361_v42  ;;  %v1325_v42 = vor.u32 %v1533_v32, %v1322_v33  ;;  %v1306_v61 = vld [vmem:[%s2323_s1 + $0x248] sm:$0xf0] }
  0x38   :  { %691 = vmatpush.bf16.msrb.mxu0 %v1289_v47  ;;  %v1314_v47 = vld [vmem:[%s2323_s1 + $0x258] sm:$0xf0] }
  0x39   :  { %742 = vmatpush.bf16.msra.mxu2 %v1109_v44  ;;  %v1499_v44 = vld [vmem:[%s2323_s1 + $0x154] sm:$0xf] }
  0x3a   :  { %730 = vmatpush.bf16.msrb.mxu3 %v1037_v48  ;;  %v1261_v48 = vor.u32 %v1517_v36, %v1258_v39  ;;  %v1189_v52 = vor.u32 %v1499_v44, %v1186_v45 }
  0x3b   :  { %704 = vmatpush.bf16.msrb.mxu1 %v1353_v56  ;;  %v1317_v56 = vor.u32 %v1531_v46, %v1314_v47 }
  0x3c   :  { %692 = vmatpush.bf16.msrb.mxu0 %v1281_v62 }
  0x3d   :  { %743 = vmatpush.bf16.msra.mxu2 %v1101_v57  ;;  %v1497_v57 = vld [vmem:[%s2323_s1 + $0x144] sm:$0xf] }
  0x3e   :  { %731 = vmatpush.bf16.msrb.mxu3 %v1029_v63 }
  0x3f   :  { %705 = vmatpush.bf16.msrb.mxu1 %v1345_v8 }
  0x40   :  { %693 = vmatpush.bf16.msrb.mxu0 %v1273_v16 }
  0x41   :  { %744 = vmatpush.bf16.msra.mxu2 %v1093_v12 }
  0x42   :  { %732 = vmatpush.bf16.msrb.mxu3 %v1021_v17 }
  0x43   :  { %706 = vmatpush.bf16.msrb.mxu1 %v1337_v26  ;;  %694 = vmatmul.bf16.vlgmr.msrb.gmra.mxu0 %v2089_v30 }
  0x44   :  { %751 = vmatpush.bf16.msra.mxu0 %v1205_v21 }
  0x45   :  { %745 = vmatpush.bf16.msra.mxu2 %v1085_v31  ;;  %733 = vmatmul.bf16.vlgmr.msrb.gmra.mxu3 %v1886_v58 }
  0x46   :  { %777 = vmatpush.bf16.msra.mxu3 %v1333_v22  ;;  %707 = vmatmul.bf16.vlgmr.msrb.gmra.mxu1 %v2100_v37 }
  0x47   :  { %764 = vmatpush.bf16.msra.mxu1 %v1269_v34 }
  0x48   :  { %752 = vmatpush.bf16.msra.mxu0 %v1197_v38  ;;  %746 = vmatmul.bf16.vlgmr.msra.gmra.mxu2 %v1908_v4 }
  0x49   :  { %790 = vmatpush.bf16.msrb.mxu2 %v1397_v35 }
  0x4a   :  { %778 = vmatpush.bf16.msra.mxu3 %v1325_v42 }
  0x4b   :  { %10 = vsyncpa [#allocation3], 0  ;;  %765 = vmatpush.bf16.msra.mxu1 %v1261_v48  ;;  %v1253_v62 = vor.u32 %v1515_v50, %v1250_v53  ;;  %v1381_v63 = vor.u32 %v1547_v54, %v1378_v55  ;;  %v1513_v0 = vld [vmem:[%s2323_s1 + $0x1c4] sm:$0xf]  ;;  %v1181_v4 = vor.u32 %v1497_v57, %v1178_v59  ;;  %v1242_v1 = vld [vmem:[%s2323_s1 + $0x1c8] sm:$0xf0]  ;;  %v1309_v5 = vor.u32 %v1529_v60, %v1306_v61 }
  0x4c   :  { %753 = vmatpush.bf16.msra.mxu0 %v1189_v52  ;;  %v1545_v2 = vld [vmem:[%s2323_s1 + $0x2c4] sm:$0xf]  ;;  %v1370_v58 = vld [vmem:[%s2323_s1 + $0x2c8] sm:$0xf0]  ;;  %v1495_v6 = vld [vmem:[%s2323_s1 + $0x134] sm:$0xf]  ;;  %v1245_v10 = vor.u32 %v1513_v0, %v1242_v1 }
  0x4d   :  { %791 = vmatpush.bf16.msrb.mxu2 %v1389_v49  ;;  %v1170_v7 = vld [vmem:[%s2323_s1 + $0x138] sm:$0xf0]  ;;  %v1527_v8 = vld [vmem:[%s2323_s1 + $0x234] sm:$0xf]  ;;  %v1373_v11 = vor.u32 %v1545_v2, %v1370_v58  ;;  %v1493_v18 = vld [vmem:[%s2323_s1 + $0x124] sm:$0xf] }
  0x4e   :  { %779 = vmatpush.bf16.msra.mxu3 %v1317_v56  ;;  %v1298_v9 = vld [vmem:[%s2323_s1 + $0x238] sm:$0xf0]  ;;  %v1511_v12 = vld [vmem:[%s2323_s1 + $0x1b4] sm:$0xf]  ;;  %v1173_v13 = vor.u32 %v1495_v6, %v1170_v7  ;;  %v1162_v19 = vld [vmem:[%s2323_s1 + $0x128] sm:$0xf0] }
  0x4f   :  { %766 = vmatpush.bf16.msra.mxu1 %v1253_v62  ;;  %v1234_v14 = vld [vmem:[%s2323_s1 + $0x1b8] sm:$0xf0]  ;;  %v1543_v15 = vld [vmem:[%s2323_s1 + $0x2b4] sm:$0xf]  ;;  %v1301_v17 = vor.u32 %v1527_v8, %v1298_v9  ;;  %v1525_v20 = vld [vmem:[%s2323_s1 + $0x224] sm:$0xf]  ;;  %v1165_v25 = vor.u32 %v1493_v18, %v1162_v19 }
  0x50   :  { %754 = vmatpush.bf16.msra.mxu0 %v1181_v4  ;;  %v1362_v16 = vld [vmem:[%s2323_s1 + $0x2b8] sm:$0xf0]  ;;  %v1290_v21 = vld [vmem:[%s2323_s1 + $0x228] sm:$0xf0]  ;;  %v1237_v22 = vor.u32 %v1511_v12, %v1234_v14  ;;  %v1509_v24 = vld [vmem:[%s2323_s1 + $0x1a4] sm:$0xf] }
  0x51   :  { %792 = vmatpush.bf16.msrb.mxu2 %v1381_v63  ;;  %v1365_v23 = vor.u32 %v1543_v15, %v1362_v16  ;;  %v1226_v26 = vld [vmem:[%s2323_s1 + $0x1a8] sm:$0xf0]  ;;  %v1541_v27 = vld [vmem:[%s2323_s1 + $0x2a4] sm:$0xf]  ;;  %v1293_v29 = vor.u32 %v1525_v20, %v1290_v21  ;;  %v1491_v31 = vld [vmem:[%s2323_s1 + $0x114] sm:$0xf] }
  0x52   :  { %780 = vmatpush.bf16.msra.mxu3 %v1309_v5  ;;  %v1354_v28 = vld [vmem:[%s2323_s1 + $0x2a8] sm:$0xf0]  ;;  %v1154_v32 = vld [vmem:[%s2323_s1 + $0x118] sm:$0xf0]  ;;  %v1523_v33 = vld [vmem:[%s2323_s1 + $0x214] sm:$0xf]  ;;  %v1229_v35 = vor.u32 %v1509_v24, %v1226_v26 }
  0x53   :  { %767 = vmatpush.bf16.msra.mxu1 %v1245_v10  ;;  %v1282_v34 = vld [vmem:[%s2323_s1 + $0x218] sm:$0xf0]  ;;  %v1357_v36 = vor.u32 %v1541_v27, %v1354_v28  ;;  %v1507_v38 = vld [vmem:[%s2323_s1 + $0x194] sm:$0xf]  ;;  %v1157_v39 = vor.u32 %v1491_v31, %v1154_v32  ;;  %v1489_v45 = vld [vmem:[%s2323_s1 + $0x104] sm:$0xf] }
  0x54   :  { %755 = vmatpush.bf16.msra.mxu0 %v1173_v13  ;;  %v1218_v40 = vld [vmem:[%s2323_s1 + $0x198] sm:$0xf0]  ;;  %v1539_v41 = vld [vmem:[%s2323_s1 + $0x294] sm:$0xf]  ;;  %v1285_v44 = vor.u32 %v1523_v33, %v1282_v34  ;;  %v1146_v46 = vld [vmem:[%s2323_s1 + $0x108] sm:$0xf0] }
  0x55   :  { %793 = vmatpush.bf16.msrb.mxu2 %v1373_v11  ;;  %v1346_v42 = vld [vmem:[%s2323_s1 + $0x298] sm:$0xf0]  ;;  %v1521_v47 = vld [vmem:[%s2323_s1 + $0x204] sm:$0xf]  ;;  %v1274_v48 = vld [vmem:[%s2323_s1 + $0x208] sm:$0xf0]  ;;  %v1221_v52 = vor.u32 %v1507_v38, %v1218_v40  ;;  %v1149_v54 = vor.u32 %v1489_v45, %v1146_v46 }
  0x56   :  { %781 = vmatpush.bf16.msra.mxu3 %v1301_v17  ;;  %v1553_v49 = vld [vmem:[%s2323_s1 + $0x304] sm:$0xf]  ;;  %v1402_v50 = vld [vmem:[%s2323_s1 + $0x308] sm:$0xf0]  ;;  %v1349_v53 = vor.u32 %v1539_v41, %v1346_v42  ;;  %v1277_v57 = vor.u32 %v1521_v47, %v1274_v48  ;;  %vm822_vm3 = vcmask 588800   ;;  %vm966_vm5 = vcmask 1043456  }
  0x57   :  { %768 = vmatpush.bf16.msra.mxu1 %v1237_v22  ;;  %v1505_v55 = vld [vmem:[%s2323_s1 + $0x184] sm:$0xf]  ;;  %v1210_v56 = vld [vmem:[%s2323_s1 + $0x188] sm:$0xf0]  ;;  %v1405_v61 = vor.u32 %v1553_v49, %v1402_v50  ;;  %v1600_v49 = vmov 200.0   ;;  %v1562_v50 = vld [vmem:[%s2325_s3 + $0x38] sm:$0xff] }
  0x58   :  { %756 = vmatpush.bf16.msra.mxu0 %v1165_v25  ;;  %v1537_v59 = vld [vmem:[%s2323_s1 + $0x284] sm:$0xf]  ;;  %v1338_v60 = vld [vmem:[%s2323_s1 + $0x288] sm:$0xf0]  ;;  %v1213_v62 = vor.u32 %v1505_v55, %v1210_v56  ;;  %1570 = vrcp.f32 %v1600_v49  ;;  %s1601_s19 = smov [#allocation2]   ;;  %s1005_s22 = sshll.u32 %s2327_s5, 4  ;;  %s1006_s22 = int_to_ptr.hbm [resolvable:$true] %s1005_s22 }
  0x59   :  { %794 = vmatpush.bf16.msrb.mxu2 %v1365_v23  ;;  %v1341_v63 = vor.u32 %v1537_v59, %v1338_v60 }
  0x5a   :  { %782 = vmatpush.bf16.msra.mxu3 %v1293_v29 }
  0x5b   :  { %769 = vmatpush.bf16.msra.mxu1 %v1229_v35 }
  0x5c   :  { %757 = vmatpush.bf16.msra.mxu0 %v1157_v39 }
  0x5d   :  { %795 = vmatpush.bf16.msrb.mxu2 %v1357_v36 }
  0x5e   :  { %783 = vmatpush.bf16.msra.mxu3 %v1285_v44 }
  0x5f   :  { %770 = vmatpush.bf16.msra.mxu1 %v1221_v52  ;;  %v1571_v52 = vpop.eup %1570 }
  0x60   :  { %758 = vmatpush.bf16.msra.mxu0 %v1149_v54  ;;  %v828_v54 = vmul.f32 200.0, %v1571_v52  ;;  %vm832_vm4 = vweird.f32 %v1571_v52 }
  0x61   :  { %796 = vmatpush.bf16.msrb.mxu2 %v1349_v53  ;;  %v1561_v53 = vld [vmem:[%s2325_s3 + $0x30] sm:$0xff] }
  0x62   :  { %784 = vmatpush.bf16.msra.mxu3 %v1277_v57  ;;  %v829_v55 = vsub.f32 1.0, %v828_v54 }
  0x63   :  { %771 = vmatpush.bf16.msra.mxu1 %v1213_v62  ;;  %759 = vmatmul.bf16.vlgmr.msra.gmra.mxu0 %v1872_v51 }
  0x64   :  { %810 = vmatpush.bf16.msrb.mxu0 %v1405_v61  ;;  %v830_v56 = vmul.f32 %v1571_v52, %v829_v55 }
  0x65   :  { %785 = vmatmul.bf16.vlgmr.msra.gmra.mxu3 %v2089_v30  ;;  %797 = vmatpush.bf16.msrb.mxu2 %v1341_v63 }
  0x66   :  { %772 = vmatmul.bf16.vlgmr.msra.gmra.mxu1 %v1906_v3  ;;  %v831_v57 = vadd.f32 %v1571_v52, %v830_v56 }
  0x67   :  { %970 = vmatpush.bf16.msrb.mxu1 %v1562_v50 }
  0x68   :  { %798 = vmatmul.bf16.vlgmr.msrb.gmra.mxu2 %v2100_v37  ;;  %v833_v59 = vsel %vm832_vm4, %v1571_v52, %v831_v57 }
  0x6b   :  { %971 = vmatpush.bf16.msrb.mxu1 %v1561_v53 }
  0x73   :  { %1407 = vmatmul.msk.bf16.vlgmr.msrb.gmra.mxu0 %vm630_vm0, %v1989_v43  ;;  %v134_v43 = vld [vmem:[%s2324_s2] sm:$0x3]  ;;  %s1003_s2 = sshll.u32 %s1601_s19, 4  ;;  %s1004_s2 = int_to_ptr.vmem [resolvable:$true] %s1003_s2 }
  0x74   :  { %v136_v37 = vperm.slane %v134_v43, 0  ;;  %v137_v16 = vperm.slane %v134_v43, 1  ;;  %v1555_v43 = vld [vmem:[%s2325_s3] sm:$0xff] }
  0xa0   :  { %v643_v0 = vpop.f32.mrf.mxu0 }
  0xa1   :  { %v644_v15 = vadd.f32 %v643_v0, %v136_v37  ;;  %v1563_v37 = vld [vmem:[%s2325_s3 + $0x40] sm:$0xff] }
  0xa3   :  { %v656_v4 = vpop.f32.mrf.mxu1 }
  0xa4   :  { %v657_v17 = vadd.f32 %v656_v4, %v644_v15 }
  0xa7   :  { %v669_v1 = vpop.f32.mrf.mxu2 }
  0xa8   :  { %v682_v2 = vpop.f32.mrf.mxu3  ;;  %v645_v58 = vpop.f32.mrf.mxu0  ;;  %v670_v19 = vadd.f32 %v669_v1, %v657_v17 }
  0xa9   :  { %v1560_v58 = vld [vmem:[%s2325_s3 + $0x28] sm:$0xff] }
  0xaa   :  { %v683_v23 = vadd.f32 %v682_v2, %v670_v19  ;;  %972 = vmatpush.bf16.msrb.mxu1 %v1560_v58 }
  0xab   :  { %v658_v5 = vpop.f32.mrf.mxu1 }
  0xac   :  { %v883_v5 = vld [vmem:[%s2325_s3 + $0x60] sm:$0xf] }
  0xaf   :  { %v671_v6 = vpop.f32.mrf.mxu2 }
  0xb0   :  { %v684_v7 = vpop.f32.mrf.mxu3  ;;  %v937_v6 = vunpack.c.l.b16 %v883_v5 }
  0xb2   :  { %v950_v7 = vpack.c.b16 %v937_v6, %v937_v6 }
  0xb7   :  { %v721_v8 = vpop.f32.mrf.mxu2 }
  0xbf   :  { %v723_v9 = vpop.f32.mrf.mxu2 }
  0xc0   :  { %v695_v51 = vpop.f32.mrf.mxu0  ;;  %v1558_v9 = vld [vmem:[%s2325_s3 + $0x18] sm:$0xff] }
  0xc1   :  { %v696_v25 = vadd.f32 %v695_v51, %v683_v23  ;;  %v968_v51 = vsel %vm966_vm5, %v950_v7, 0 }
  0xc2   :  { %986 = vmatpush.bf16.msrb.mxu3 %v968_v51 }
  0xc3   :  { %v708_v30 = vpop.f32.mrf.mxu1 }
  0xc4   :  { %v709_v29 = vadd.f32 %v708_v30, %v696_v25  ;;  %v1566_v30 = vld [vmem:[%s2325_s3 + $0x58] sm:$0xff] }
  0xc6   :  { %v722_v34 = vadd.f32 %v721_v8, %v709_v29  ;;  %v1559_v8 = vld [vmem:[%s2325_s3 + $0x20] sm:$0xff]  ;;  %987 = vmatpush.bf16.msrb.mxu3 %v1566_v30 }
  0xc7   :  { %973 = vmatpush.bf16.msrb.mxu1 %v1559_v8 }
  0xc8   :  { %v697_v10 = vpop.f32.mrf.mxu0  ;;  %v734_v3 = vpop.f32.mrf.mxu3  ;;  %v818_v40 = vmul.f32 0.01, %v722_v34  ;;  %vm816_vm1 = vcmp.gt.f32.partialorder %v722_v34, 0.0 }
  0xc9   :  { %v735_v18 = vadd.f32 %v734_v3, %v137_v16  ;;  %v1557_v10 = vld [vmem:[%s2325_s3 + $0x10] sm:$0xff]  ;;  %v1556_v3 = vld [vmem:[%s2325_s3 + $0x8] sm:$0xff] }
  0xca   :  { %v820_v45 = vsel %vm816_vm1, %v722_v34, %v818_v40 }
  0xcb   :  { %v747_v11 = vpop.f32.mrf.mxu2  ;;  %v710_v12 = vpop.f32.mrf.mxu1  ;;  %974 = vmatpush.bf16.msrb.mxu1 %v1558_v9 }
  0xcc   :  { %v748_v21 = vadd.f32 %v747_v11, %v735_v18  ;;  %v1565_v11 = vld [vmem:[%s2325_s3 + $0x50] sm:$0xff]  ;;  %v1564_v12 = vld [vmem:[%s2325_s3 + $0x48] sm:$0xff] }
  0xcd   :  { %988 = vmatpush.bf16.msrb.mxu3 %v1565_v11 }
  0xcf   :  { %975 = vmatpush.bf16.msrb.mxu1 %v1557_v10 }
  0xd0   :  { %v736_v14 = vpop.f32.mrf.mxu3 }
  0xd1   :  { %989 = vmatpush.bf16.msrb.mxu3 %v1564_v12 }
  0xd3   :  { %v749_v13 = vpop.f32.mrf.mxu2  ;;  %976 = vmatpush.bf16.msrb.mxu1 %v1556_v3 }
  0xd5   :  { %990 = vmatpush.bf16.msrb.mxu3 %v1563_v37 }
  0xd7   :  { %977 = vmatpush.bf16.msrb.mxu1 %v1555_v43 }
  0xe0   :  { %v760_v20 = vpop.f32.mrf.mxu0 }
  0xe1   :  { %v761_v24 = vadd.f32 %v760_v20, %v748_v21 }
  0xe3   :  { %v773_v22 = vpop.f32.mrf.mxu1 }
  0xe4   :  { %v774_v28 = vadd.f32 %v773_v22, %v761_v24 }
  0xe8   :  { %v786_v26 = vpop.f32.mrf.mxu3  ;;  %v762_v27 = vpop.f32.mrf.mxu0 }
  0xe9   :  { %v787_v32 = vadd.f32 %v786_v26, %v774_v28  ;;  %v1569_v28 = vld [vmem:[%s2326_s4] ss:$0 sm:$0xff] }
  0xeb   :  { %v799_v31 = vpop.f32.mrf.mxu2  ;;  %v775_v33 = vpop.f32.mrf.mxu1 }
  0xec   :  { %v800_v35 = vadd.f32 %v799_v31, %v787_v32 }
  0xf0   :  { %v788_v36 = vpop.f32.mrf.mxu3  ;;  %v812_v38 = vpop.f32.mrf.mxu0 }
  0xf1   :  { %v813_v39 = vadd.f32 %v812_v38, %v800_v35 }
  0xf3   :  { %v801_v41 = vpop.f32.mrf.mxu2  ;;  %v819_v42 = vmul.f32 0.01, %v813_v39  ;;  %vm817_vm2 = vcmp.gt.f32.partialorder %v813_v39, 0.0 }
  0xf5   :  { %v821_v44 = vsel %vm817_vm2, %v813_v39, %v819_v42 }
  0xf6   :  { %v823_v46 = vsel %vm822_vm3, %v821_v44, 0.0 }
  0xf7   :  { %v824_v47 = vadd.f32 %v823_v46, %v820_v45 }
  0xf8   :  { %v814_v48 = vpop.f32.mrf.mxu0 }
  0xf9   :  { %825 = vadd.xlane.f32.xlu0 %v824_v47 }
 0x16c   :  { %v826_v60 = vpop.xlane.xlu0 %825 }
 0x16d   :  { %v834_v61 = vmul.f32 %v833_v59, %v826_v60 }
 0x16f   :  { %v835_v62 = vsub.f32 %v820_v45, %v834_v61  ;;  %v836_v63 = vsub.f32 %v821_v44, %v834_v61 }
 0x171   :  { %v837_v0 = vmul.f32 %v835_v62, %v835_v62  ;;  %v838_v4 = vmul.f32 %v836_v63, %v836_v63 }
 0x173   :  { %v839_v1 = vsel %vm822_vm3, %v838_v4, 0.0 }
 0x174   :  { %v840_v2 = vadd.f32 %v839_v1, %v837_v0 }
 0x176   :  { %841 = vadd.xlane.f32.xlu0 %v840_v2 }
 0x1e9   :  { %v842_v13 = vpop.xlane.xlu0 %841 }
 0x1ea   :  { %v843_v14 = vmul.f32 %v842_v13, %v833_v59 }
 0x1ec   :  { %v844_v15 = vadd.f32 1e-05, %v843_v14 }
 0x1ee   :  { %1572 = vrsqrt.f32 %v844_v15  ;;  %vm851_vm7 = vweird.f32 %v844_v15 }
 0x1f4   :  { %v1573_v16 = vpop.eup %1572 }
 0x1f5   :  { %v846_v17 = vmul.f32 %v1573_v16, %v844_v15  ;;  %vm852_vm6 = vweird.f32 %v1573_v16 }
 0x1f6   :  { %vm853_vm8 = vmor %vm851_vm7, %vm852_vm6 }
 0x1f7   :  { %v847_v18 = vmul.f32 %v1573_v16, %v846_v17 }
 0x1f9   :  { %v848_v19 = vmul.f32 0.5, %v847_v18 }
 0x1fb   :  { %v849_v20 = vsub.f32 1.5, %v848_v19 }
 0x1fd   :  { %v850_v21 = vmul.f32 %v1573_v16, %v849_v20 }
 0x1ff   :  { %v854_v22 = vsel %vm853_vm8, %v1573_v16, %v850_v21 }
 0x200   :  { %v856_v23 = vmul.f32 %v854_v22, %v836_v63  ;;  %v855_v24 = vmul.f32 %v854_v22, %v835_v62 }
 0x202   :  { %v858_v25 = vpack.c.bf16 %v856_v23, %v856_v23  ;;  %v857_v26 = vpack.c.bf16 %v855_v24, %v855_v24 }
 0x204   :  { %978 = vmatmul.bf16.vlgmr.msrb.gmra.mxu1 %v857_v26  ;;  %1456 = vmatmul.msk.bf16.vlgmr.msrb.gmra.mxu3 %vm822_vm3, %v858_v25 }
 0x281   :  { %v979_v27 = vpop.f32.mrf.mxu1 }
 0x282   :  { %v980_v29 = vadd.f32 %v1569_v28, %v979_v27 }
 0x287   :  { %v992_v31 = vpop.f32.mrf.mxu3 }
 0x288   :  { %v993_v32 = vadd.f32 %v992_v31, %v980_v29 }
 0x289   :  { %v981_v33 = vpop.f32.mrf.mxu1 }
 0x28a   :  { %v996_v34 = vpack.c.bf16 %v993_v32, %v993_v32 }
 0x28c   :  { %997 = vst [vmem:[#allocation2] sm:$0xf] %v996_v34 }
 0x28d   :  { %1008 = dma.vmem_to_hbm [thread:$0]  %s1004_s2, 64, %s1006_s22, [#allocation3]  }
 0x28f   :  { %v994_v35 = vpop.f32.mrf.mxu3 }
 0x290   :  { %1598 = dma.done.wait [#allocation3], 64  }
 0x291   :  { %1599 = vsyncadd [#allocation3], 4294967232 }
 0x292   :  { %1013 = vsyncpa [#allocation3], 1 }

</bundles_post_ra>
